<compile_context>
chip_gen: v6e
topology: v6e:2x2x1
jax: 0.10.0
libtpu: 0.0.40
codegen_flags: <defaults>
</compile_context>

<pallas_src>
import jax
import jax.numpy as jnp
import numpy as np
from jax.experimental import pallas as pl
from jax.experimental.pallas import tpu as pltpu


def _make_kernel(C, N, tile_w, num_tiles, tiles_per_split, needs_mask):
    n_full = tile_w // 128
    rem = tile_w - n_full * 128   # nonzero only in the single-tile (tile_w == N) case

    def kernel(loss_ref, out_ref):
        # loss_ref: (C, tile_w) f32 — one lane-tile of the stacked losses (NaN = missing)
        # out_ref:  (C, 128)   f32 — lane-dense partial-sum slab, resident across kj
        s = pl.program_id(0)
        kj = pl.program_id(1)

        @pl.when(kj == 0)
        def _init():
            out_ref[...] = jnp.zeros((C, 128), jnp.float32)

        partial = jnp.zeros((C, 128), jnp.float32)

        if needs_mask:
            t = s * tiles_per_split + kj                        # logical tile index
            lane = jax.lax.broadcasted_iota(jnp.int32, (C, 128), 1)
            col = t * tile_w + lane                             # global column of chunk-0 lanes

        for c in range(n_full):
            v = loss_ref[:, c * 128:(c + 1) * 128]              # per-chunk ref slice
            keep = v > 0.0                                      # clamp(min=0) + NaN fused
            if needs_mask:
                keep = keep & (col < (N - c * 128))             # ragged tail / wasted step
            partial = partial + jnp.where(keep, v, 0.0)

        if rem:
            # sub-128 tail of a single full-width tile (tile_w == N, N % 128 != 0)
            v = loss_ref[:, n_full * 128:n_full * 128 + rem]
            rsum = jnp.sum(jnp.where(v > 0.0, v, 0.0), axis=-1, keepdims=True)  # (C, 1)
            lane0 = jax.lax.broadcasted_iota(jnp.int32, (C, 128), 1)
            partial = partial + jnp.where(lane0 == 0, rsum, 0.0)

        out_ref[...] += partial

    return kernel


def primaldual_loss(loss_stack, lmbd, lmbd_p, *, tile_n=4096,
                    vmem_block_bytes=4 * 1024 * 1024):
    """loss_stack: (C, N) float (NaN = missing); lmbd, lmbd_p: (C,).
    Returns (total primal-dual loss scalar, per-constraint weighted loss (C,))."""
    loss_stack = loss_stack.astype(jnp.float32)
    C, N = loss_stack.shape

    # get_lmbd(): lmbd.clamp(max=lmbd_p). O(C) scalar work stays in plain XLA.
    lam = jnp.minimum(lmbd.astype(jnp.float32), lmbd_p.astype(jnp.float32))

    if C == 0 or N == 0:
        per = jnp.zeros((C,), jnp.float32)
        return jnp.float32(0.0), per

    # Lane-tile width: multiple of 128, big enough to amortize the ~0.35us
    # per-grid-step overhead, small enough that 2x(input block) <= ~8 MiB
    # (fits v5e's 16 MiB scoped-VMEM default with plenty of headroom).
    cap = max(128, (vmem_block_bytes // (4 * C)) // 128 * 128)
    tile_cap = max(128, min(max(128, (tile_n // 128) * 128), cap))

    if N <= tile_cap:
        tile_w, num_tiles = N, 1            # single full-width block (grid collapses)
    else:
        tile_w = tile_cap
        num_tiles = -(-N // tile_w)         # ragged last tile handled by in-kernel mask

    # Split the N reduction across a leading parallel axis so both v7x
    # TensorCores stream half the data (harmless no-op on 1-TC v5e/v6e).
    n_split = 2 if num_tiles >= 2 else 1
    tiles_per_split = -(-num_tiles // n_split)

    needs_mask = (num_tiles * tile_w != N) or (n_split * tiles_per_split != num_tiles)

    def loss_map(s, kj):
        t = s * tiles_per_split + kj
        return (0, jnp.minimum(t, num_tiles - 1))   # clamp wasted steps to a valid block

    kernel = _make_kernel(C, N, tile_w, num_tiles, tiles_per_split, needs_mask)

    slab = pl.pallas_call(
        kernel,
        out_shape=jax.ShapeDtypeStruct((n_split, C, 128), jnp.float32),
        grid_spec=pltpu.PrefetchScalarGridSpec(
            num_scalar_prefetch=0,
            grid=(n_split, tiles_per_split),
            in_specs=[pl.BlockSpec((C, tile_w), loss_map)],
            out_specs=pl.BlockSpec((None, C, 128), lambda s, kj: (s, 0, 0)),
        ),
        compiler_params=pltpu.CompilerParams(
            dimension_semantics=("parallel", "arbitrary")),
    )(loss_stack)

    nansum = jnp.sum(slab, axis=(0, 2))     # (C,)  nansum(clamp(L_i, min=0))
    per = lam * nansum                      # per-constraint weighted loss
    total = jnp.sum(per)                    # lmbd_loss = sum_i out_i
    return total, per


def _reference(loss_stack, lmbd, lmbd_p):
    x = jnp.maximum(loss_stack, 0.0)               # clamp(min=0), NaN propagates
    x = jnp.where(jnp.isnan(x), 0.0, x)            # nansum mask
    nansum = jnp.sum(x, axis=-1)
    per = jnp.minimum(lmbd, lmbd_p) * nansum
    return jnp.sum(per), per


def _make_lambdas(C):
    # Parameters per the module's __init__: lmbd initialized to 1.0;
    # lmbd_p[i] = -log(1 - p_i), p_i from LC priority (p==1 nudged below 1).
    base = np.array([0.90, 0.80, 1.0, 0.70], dtype=np.float64)
    p = np.resize(base, C)
    p = np.where(p == 1.0, 0.999999999999999, p)
    lmbd = jnp.ones((C,), dtype=jnp.float32)
    lmbd_p = jnp.asarray(-np.log(1.0 - p), dtype=jnp.float32)
    return lmbd, lmbd_p


def _make_loss(key, C, N, nan_p=0.1):
    k1, k2 = jax.random.split(key)
    x = jax.random.normal(k1, (C, N), dtype=jnp.float32)
    nan_mask = jax.random.bernoulli(k2, p=nan_p, shape=(C, N))
    return jnp.where(nan_mask, jnp.nan, x)


if __name__ == "__main__":
    key = jax.random.PRNGKey(0)
    cases = [
        # (C, N, tile_n) — small shapes consistent with a handful of constraints
        (12, 2048, 4096),   # single full-width block, grid collapses to (1, 1)
        (12, 1700, 256),    # multi-tile, ragged last tile, 2-way parallel split
        (5, 300, 4096),     # C not multiple of 8, N not multiple of 128 (tail path)
    ]
    for idx, (C, N, tile_n) in enumerate(cases):
        key, sub = jax.random.split(key)
        loss_stack = _make_loss(sub, C, N)
        lmbd, lmbd_p = _make_lambdas(C)

        total, per = primaldual_loss(loss_stack, lmbd, lmbd_p, tile_n=tile_n)
        total = jax.block_until_ready(total)
        per = jax.block_until_ready(per)

        ref_total, ref_per = _reference(loss_stack, lmbd, lmbd_p)
        np.testing.assert_allclose(np.asarray(total), np.asarray(ref_total),
                                   rtol=1e-4, atol=1e-4)
        np.testing.assert_allclose(np.asarray(per), np.asarray(ref_per),
                                   rtol=1e-4, atol=1e-4)
    print("KERNEL_OK")
</pallas_src>

<mosaic_0001>
module attributes {stable_mosaic.version = 11 : i64} {
  func.func @kernel(%arg0: i32, %arg1: i32, %arg2: memref<12x2048xf32, #tpu.memory_space<vmem>>, %arg3: memref<1x12x128xf32, #tpu.memory_space<vmem>>) attributes {dimension_semantics = [#tpu.dimension_semantics<parallel>, #tpu.dimension_semantics<arbitrary>], iteration_bounds = array<i64: 1, 1>, scalar_prefetch = 0 : i64, scratch_operands = 0 : i64, tpu.core_type = #tpu.core_type<tc>, window_params = [{transform_indices = @transform_0, window_bounds = array<i64: 12, 2048>}, {transform_indices = @transform_1, window_bounds = array<i64: 1, 12, 128>}]} {
    %c0_i32 = arith.constant 0 : i32
    %0 = arith.cmpi eq, %arg1, %c0_i32 : i32
    %1 = arith.extui %0 : i1 to i32
    %c0_i32_0 = arith.constant 0 : i32
    %2 = arith.cmpi ne, %1, %c0_i32_0 : i32
    scf.if %2 {
      %cst_55 = arith.constant 0.000000e+00 : f32
      %106 = vector.broadcast %cst_55 : f32 to vector<12x128xf32>
      %c0_56 = arith.constant 0 : index
      %c0_57 = arith.constant 0 : index
      %c0_58 = arith.constant 0 : index
      %107 = vector.load %arg3[%c0_56, %c0_57, %c0_58] : memref<1x12x128xf32, #tpu.memory_space<vmem>>, vector<1x12x128xf32>
      %108 = vector.shape_cast %107 : vector<1x12x128xf32> to vector<12x128xf32>
      %109 = vector.shape_cast %106 : vector<12x128xf32> to vector<1x12x128xf32>
      tpu.vector_store %arg3[%c0_56, %c0_57, %c0_58], %109 {strides = array<i32>} : memref<1x12x128xf32, #tpu.memory_space<vmem>>, vector<1x12x128xf32>,
    } else {
    }
    %cst = arith.constant 0.000000e+00 : f32
    %3 = vector.broadcast %cst : f32 to vector<12x128xf32>
    %c0 = arith.constant 0 : index
    %c0_1 = arith.constant 0 : index
    %4 = vector.load %arg2[%c0, %c0_1] : memref<12x2048xf32, #tpu.memory_space<vmem>>, vector<12x128xf32>
    %cst_2 = arith.constant 0.000000e+00 : f32
    %5 = vector.broadcast %cst_2 : f32 to vector<12x128xf32>
    %6 = arith.cmpf ogt, %4, %5 : vector<12x128xf32>
    %cst_3 = arith.constant 0.000000e+00 : f32
    %7 = vector.broadcast %cst_3 : f32 to vector<12x128xf32>
    %8 = arith.select %6, %4, %7 : vector<12x128xi1>, vector<12x128xf32>
    %9 = arith.addf %3, %8 : vector<12x128xf32>
    %c0_4 = arith.constant 0 : index
    %c128 = arith.constant 128 : index
    %10 = vector.load %arg2[%c0_4, %c128] : memref<12x2048xf32, #tpu.memory_space<vmem>>, vector<12x128xf32>
    %cst_5 = arith.constant 0.000000e+00 : f32
    %11 = vector.broadcast %cst_5 : f32 to vector<12x128xf32>
    %12 = arith.cmpf ogt, %10, %11 : vector<12x128xf32>
    %cst_6 = arith.constant 0.000000e+00 : f32
    %13 = vector.broadcast %cst_6 : f32 to vector<12x128xf32>
    %14 = arith.select %12, %10, %13 : vector<12x128xi1>, vector<12x128xf32>
    %15 = arith.addf %9, %14 : vector<12x128xf32>
    %c0_7 = arith.constant 0 : index
    %c256 = arith.constant 256 : index
    %16 = vector.load %arg2[%c0_7, %c256] : memref<12x2048xf32, #tpu.memory_space<vmem>>, vector<12x128xf32>
    %cst_8 = arith.constant 0.000000e+00 : f32
    %17 = vector.broadcast %cst_8 : f32 to vector<12x128xf32>
    %18 = arith.cmpf ogt, %16, %17 : vector<12x128xf32>
    %cst_9 = arith.constant 0.000000e+00 : f32
    %19 = vector.broadcast %cst_9 : f32 to vector<12x128xf32>
    %20 = arith.select %18, %16, %19 : vector<12x128xi1>, vector<12x128xf32>
    %21 = arith.addf %15, %20 : vector<12x128xf32>
    %c0_10 = arith.constant 0 : index
    %c384 = arith.constant 384 : index
    %22 = vector.load %arg2[%c0_10, %c384] : memref<12x2048xf32, #tpu.memory_space<vmem>>, vector<12x128xf32>
    %cst_11 = arith.constant 0.000000e+00 : f32
    %23 = vector.broadcast %cst_11 : f32 to vector<12x128xf32>
    %24 = arith.cmpf ogt, %22, %23 : vector<12x128xf32>
    %cst_12 = arith.constant 0.000000e+00 : f32
    %25 = vector.broadcast %cst_12 : f32 to vector<12x128xf32>
    %26 = arith.select %24, %22, %25 : vector<12x128xi1>, vector<12x128xf32>
    %27 = arith.addf %21, %26 : vector<12x128xf32>
    %c0_13 = arith.constant 0 : index
    %c512 = arith.constant 512 : index
    %28 = vector.load %arg2[%c0_13, %c512] : memref<12x2048xf32, #tpu.memory_space<vmem>>, vector<12x128xf32>
    %cst_14 = arith.constant 0.000000e+00 : f32
    %29 = vector.broadcast %cst_14 : f32 to vector<12x128xf32>
    %30 = arith.cmpf ogt, %28, %29 : vector<12x128xf32>
    %cst_15 = arith.constant 0.000000e+00 : f32
    %31 = vector.broadcast %cst_15 : f32 to vector<12x128xf32>
    %32 = arith.select %30, %28, %31 : vector<12x128xi1>, vector<12x128xf32>
    %33 = arith.addf %27, %32 : vector<12x128xf32>
    %c0_16 = arith.constant 0 : index
    %c640 = arith.constant 640 : index
    %34 = vector.load %arg2[%c0_16, %c640] : memref<12x2048xf32, #tpu.memory_space<vmem>>, vector<12x128xf32>
    %cst_17 = arith.constant 0.000000e+00 : f32
    %35 = vector.broadcast %cst_17 : f32 to vector<12x128xf32>
    %36 = arith.cmpf ogt, %34, %35 : vector<12x128xf32>
    %cst_18 = arith.constant 0.000000e+00 : f32
    %37 = vector.broadcast %cst_18 : f32 to vector<12x128xf32>
    %38 = arith.select %36, %34, %37 : vector<12x128xi1>, vector<12x128xf32>
    %39 = arith.addf %33, %38 : vector<12x128xf32>
    %c0_19 = arith.constant 0 : index
    %c768 = arith.constant 768 : index
    %40 = vector.load %arg2[%c0_19, %c768] : memref<12x2048xf32, #tpu.memory_space<vmem>>, vector<12x128xf32>
    %cst_20 = arith.constant 0.000000e+00 : f32
    %41 = vector.broadcast %cst_20 : f32 to vector<12x128xf32>
    %42 = arith.cmpf ogt, %40, %41 : vector<12x128xf32>
    %cst_21 = arith.constant 0.000000e+00 : f32
    %43 = vector.broadcast %cst_21 : f32 to vector<12x128xf32>
    %44 = arith.select %42, %40, %43 : vector<12x128xi1>, vector<12x128xf32>
    %45 = arith.addf %39, %44 : vector<12x128xf32>
    %c0_22 = arith.constant 0 : index
    %c896 = arith.constant 896 : index
    %46 = vector.load %arg2[%c0_22, %c896] : memref<12x2048xf32, #tpu.memory_space<vmem>>, vector<12x128xf32>
    %cst_23 = arith.constant 0.000000e+00 : f32
    %47 = vector.broadcast %cst_23 : f32 to vector<12x128xf32>
    %48 = arith.cmpf ogt, %46, %47 : vector<12x128xf32>
    %cst_24 = arith.constant 0.000000e+00 : f32
    %49 = vector.broadcast %cst_24 : f32 to vector<12x128xf32>
    %50 = arith.select %48, %46, %49 : vector<12x128xi1>, vector<12x128xf32>
    %51 = arith.addf %45, %50 : vector<12x128xf32>
    %c0_25 = arith.constant 0 : index
    %c1024 = arith.constant 1024 : index
    %52 = vector.load %arg2[%c0_25, %c1024] : memref<12x2048xf32, #tpu.memory_space<vmem>>, vector<12x128xf32>
    %cst_26 = arith.constant 0.000000e+00 : f32
    %53 = vector.broadcast %cst_26 : f32 to vector<12x128xf32>
    %54 = arith.cmpf ogt, %52, %53 : vector<12x128xf32>
    %cst_27 = arith.constant 0.000000e+00 : f32
    %55 = vector.broadcast %cst_27 : f32 to vector<12x128xf32>
    %56 = arith.select %54, %52, %55 : vector<12x128xi1>, vector<12x128xf32>
    %57 = arith.addf %51, %56 : vector<12x128xf32>
    %c0_28 = arith.constant 0 : index
    %c1152 = arith.constant 1152 : index
    %58 = vector.load %arg2[%c0_28, %c1152] : memref<12x2048xf32, #tpu.memory_space<vmem>>, vector<12x128xf32>
    %cst_29 = arith.constant 0.000000e+00 : f32
    %59 = vector.broadcast %cst_29 : f32 to vector<12x128xf32>
    %60 = arith.cmpf ogt, %58, %59 : vector<12x128xf32>
    %cst_30 = arith.constant 0.000000e+00 : f32
    %61 = vector.broadcast %cst_30 : f32 to vector<12x128xf32>
    %62 = arith.select %60, %58, %61 : vector<12x128xi1>, vector<12x128xf32>
    %63 = arith.addf %57, %62 : vector<12x128xf32>
    %c0_31 = arith.constant 0 : index
    %c1280 = arith.constant 1280 : index
    %64 = vector.load %arg2[%c0_31, %c1280] : memref<12x2048xf32, #tpu.memory_space<vmem>>, vector<12x128xf32>
    %cst_32 = arith.constant 0.000000e+00 : f32
    %65 = vector.broadcast %cst_32 : f32 to vector<12x128xf32>
    %66 = arith.cmpf ogt, %64, %65 : vector<12x128xf32>
    %cst_33 = arith.constant 0.000000e+00 : f32
    %67 = vector.broadcast %cst_33 : f32 to vector<12x128xf32>
    %68 = arith.select %66, %64, %67 : vector<12x128xi1>, vector<12x128xf32>
    %69 = arith.addf %63, %68 : vector<12x128xf32>
    %c0_34 = arith.constant 0 : index
    %c1408 = arith.constant 1408 : index
    %70 = vector.load %arg2[%c0_34, %c1408] : memref<12x2048xf32, #tpu.memory_space<vmem>>, vector<12x128xf32>
    %cst_35 = arith.constant 0.000000e+00 : f32
    %71 = vector.broadcast %cst_35 : f32 to vector<12x128xf32>
    %72 = arith.cmpf ogt, %70, %71 : vector<12x128xf32>
    %cst_36 = arith.constant 0.000000e+00 : f32
    %73 = vector.broadcast %cst_36 : f32 to vector<12x128xf32>
    %74 = arith.select %72, %70, %73 : vector<12x128xi1>, vector<12x128xf32>
    %75 = arith.addf %69, %74 : vector<12x128xf32>
    %c0_37 = arith.constant 0 : index
    %c1536 = arith.constant 1536 : index
    %76 = vector.load %arg2[%c0_37, %c1536] : memref<12x2048xf32, #tpu.memory_space<vmem>>, vector<12x128xf32>
    %cst_38 = arith.constant 0.000000e+00 : f32
    %77 = vector.broadcast %cst_38 : f32 to vector<12x128xf32>
    %78 = arith.cmpf ogt, %76, %77 : vector<12x128xf32>
    %cst_39 = arith.constant 0.000000e+00 : f32
    %79 = vector.broadcast %cst_39 : f32 to vector<12x128xf32>
    %80 = arith.select %78, %76, %79 : vector<12x128xi1>, vector<12x128xf32>
    %81 = arith.addf %75, %80 : vector<12x128xf32>
    %c0_40 = arith.constant 0 : index
    %c1664 = arith.constant 1664 : index
    %82 = vector.load %arg2[%c0_40, %c1664] : memref<12x2048xf32, #tpu.memory_space<vmem>>, vector<12x128xf32>
    %cst_41 = arith.constant 0.000000e+00 : f32
    %83 = vector.broadcast %cst_41 : f32 to vector<12x128xf32>
    %84 = arith.cmpf ogt, %82, %83 : vector<12x128xf32>
    %cst_42 = arith.constant 0.000000e+00 : f32
    %85 = vector.broadcast %cst_42 : f32 to vector<12x128xf32>
    %86 = arith.select %84, %82, %85 : vector<12x128xi1>, vector<12x128xf32>
    %87 = arith.addf %81, %86 : vector<12x128xf32>
    %c0_43 = arith.constant 0 : index
    %c1792 = arith.constant 1792 : index
    %88 = vector.load %arg2[%c0_43, %c1792] : memref<12x2048xf32, #tpu.memory_space<vmem>>, vector<12x128xf32>
    %cst_44 = arith.constant 0.000000e+00 : f32
    %89 = vector.broadcast %cst_44 : f32 to vector<12x128xf32>
    %90 = arith.cmpf ogt, %88, %89 : vector<12x128xf32>
    %cst_45 = arith.constant 0.000000e+00 : f32
    %91 = vector.broadcast %cst_45 : f32 to vector<12x128xf32>
    %92 = arith.select %90, %88, %91 : vector<12x128xi1>, vector<12x128xf32>
    %93 = arith.addf %87, %92 : vector<12x128xf32>
    %c0_46 = arith.constant 0 : index
    %c1920 = arith.constant 1920 : index
    %94 = vector.load %arg2[%c0_46, %c1920] : memref<12x2048xf32, #tpu.memory_space<vmem>>, vector<12x128xf32>
    %cst_47 = arith.constant 0.000000e+00 : f32
    %95 = vector.broadcast %cst_47 : f32 to vector<12x128xf32>
    %96 = arith.cmpf ogt, %94, %95 : vector<12x128xf32>
    %cst_48 = arith.constant 0.000000e+00 : f32
    %97 = vector.broadcast %cst_48 : f32 to vector<12x128xf32>
    %98 = arith.select %96, %94, %97 : vector<12x128xi1>, vector<12x128xf32>
    %99 = arith.addf %93, %98 : vector<12x128xf32>
    %c0_49 = arith.constant 0 : index
    %c0_50 = arith.constant 0 : index
    %c0_51 = arith.constant 0 : index
    %100 = vector.load %arg3[%c0_49, %c0_50, %c0_51] : memref<1x12x128xf32, #tpu.memory_space<vmem>>, vector<1x12x128xf32>
    %101 = vector.shape_cast %100 : vector<1x12x128xf32> to vector<12x128xf32>
    %102 = arith.addf %101, %99 : vector<12x128xf32>
    %c0_52 = arith.constant 0 : index
    %c0_53 = arith.constant 0 : index
    %c0_54 = arith.constant 0 : index
    %103 = vector.load %arg3[%c0_52, %c0_53, %c0_54] : memref<1x12x128xf32, #tpu.memory_space<vmem>>, vector<1x12x128xf32>
    %104 = vector.shape_cast %103 : vector<1x12x128xf32> to vector<12x128xf32>
    %105 = vector.shape_cast %102 : vector<12x128xf32> to vector<1x12x128xf32>
    tpu.vector_store %arg3[%c0_52, %c0_53, %c0_54], %105 {strides = array<i32>} : memref<1x12x128xf32, #tpu.memory_space<vmem>>, vector<1x12x128xf32>,
    return
  }
  func.func @transform_0(%arg0: i32, %arg1: i32) -> (i32, i32) {
    %c1_i32 = arith.constant 1 : i32
    %0 = arith.muli %arg0, %c1_i32 : i32
    %1 = arith.addi %0, %arg1 : i32
    %c0_i32 = arith.constant 0 : i32
    %2 = arith.minsi %1, %c0_i32 : i32
    %c0_i32_0 = arith.constant 0 : i32
    %c0_i32_1 = arith.constant 0 : i32
    return %c0_i32_0, %2 : i32, i32
  }
  func.func @transform_1(%arg0: i32, %arg1: i32) -> (i32, i32, i32) {
    %c0_i32 = arith.constant 0 : i32
    %c0_i32_0 = arith.constant 0 : i32
    %c0_i32_1 = arith.constant 0 : i32
    return %arg0, %c0_i32, %c0_i32_0 : i32, i32, i32
  }
}

</mosaic_0001>

<bundles_post_ra>
// kernel: tpu_custom_call.1
= control target key start
LH: loop header
LB: loop body
LE: loop exit
PB: predicated region body
PF: predicated region fallthrough
CT: control target
= control target key end

     0   :  { %6 = vsyncpa [#allocation3], 0  ;;  %s205_s6 = smov [#allocation2]   ;;  %s235_s0 = inlined_call_operand.hbm [shape: f32[12,2048], index: 0, kind: input, shape index: {}]   ;;  %s236_s1 = inlined_call_operand.vmem [shape: f32[1,12,128], index: 1, kind: output, shape index: {}]  }
   0x1   :  { %s18_s7 = sshll.u32 %s205_s6, 4  ;;  %s19_s7 = int_to_ptr.vmem [resolvable:$true] %s18_s7 }
   0x2   :  { %s191_s8 = scalar_lea.vmem %s19_s7, 4096  ;;  %p196_p1 = scmp.lt.s32.totalorder %s19_s7, %s19_s7 }
   0x3   :  { %p192_p0 = scmp.ne.s32.totalorder %s19_s7, %s191_s8  ;;  %p197_p2 = scmp.lt.s32.totalorder %s191_s8, %s191_s8 }
   0x5   :  { %p198_p3 = por %p197_p2, %p196_p1 }
   0x7   :  { %p199_p4 = pnand %p198_p3, %p192_p0 }
   0x9   :  { %202 = shalt.err (!%p199_p4)
}
   0xa   :  { %s206_s9 = smov 2048   ;;  %s207_s10 = smov 128  }
   0xb   :  { %24 = dma.hbm_to_vmem [thread:$0]  %s235_s0, 4096, %s19_s7, [#allocation3], %s206_s9, %s206_s9, %s207_s10  }
   0xc   :  { %203 = dma.done.wait [#allocation3], 4096  }
   0xd   :  { %204 = vsyncadd [#allocation3], 4294963200  ;;  %v208_v0 = vmov 0.0   ;;  %v38_v1 = vld [vmem:[#allocation2] sm:$0xff]  ;;  %v46_v2 = vld [vmem:[#allocation2 + $0x8] sm:$0xff] }
   0xe   :  { %37 = vst [vmem:[%s236_s1 + $0x8] sm:$0xf] %v208_v0  ;;  %v54_v3 = vld [vmem:[#allocation2 + $0x10] sm:$0xff]  ;;  %vm40_vm0 = vcmp.gt.f32.partialorder %v38_v1, 0.0  ;;  %vm48_vm1 = vcmp.gt.f32.partialorder %v46_v2, 0.0  ;;  %v62_v4 = vld [vmem:[#allocation2 + $0x18] sm:$0xff] }
   0xf   :  { %vm56_vm2 = vcmp.gt.f32.partialorder %v54_v3, 0.0  ;;  %v70_v5 = vld [vmem:[#allocation2 + $0x20] sm:$0xff]  ;;  %v42_v6 = vsel %vm40_vm0, %v38_v1, 0.0  ;;  %v50_v7 = vsel %vm48_vm1, %v46_v2, 0.0  ;;  %vm64_vm3 = vcmp.gt.f32.partialorder %v62_v4, 0.0  ;;  %v78_v9 = vld [vmem:[#allocation2 + $0x28] sm:$0xff] }
  0x10   :  { %v58_v8 = vsel %vm56_vm2, %v54_v3, 0.0  ;;  %v52_v10 = vadd.f32 %v50_v7, %v42_v6  ;;  %vm72_vm4 = vcmp.gt.f32.partialorder %v70_v5, 0.0  ;;  %v86_v11 = vld [vmem:[#allocation2 + $0x30] sm:$0xff]  ;;  %v66_v12 = vsel %vm64_vm3, %v62_v4, 0.0  ;;  %v94_v15 = vld [vmem:[#allocation2 + $0x38] sm:$0xff]  ;;  %v102_v17 = vld [vmem:[#allocation2 + $0x40] sm:$0xff] }
  0x11   :  { %vm80_vm5 = vcmp.gt.f32.partialorder %v78_v9, 0.0  ;;  %v74_v14 = vsel %vm72_vm4, %v70_v5, 0.0  ;;  %vm88_vm6 = vcmp.gt.f32.partialorder %v86_v11, 0.0  ;;  %v39_v18 = vld [vmem:[#allocation2 + $0x80] sm:$0xf]  ;;  %vm96_vm7 = vcmp.gt.f32.partialorder %v94_v15, 0.0 }
  0x12   :  { %v60_v13 = vadd.f32 %v58_v8, %v52_v10  ;;  %v47_v19 = vld [vmem:[#allocation2 + $0x88] sm:$0xf]  ;;  %v82_v20 = vsel %vm80_vm5, %v78_v9, 0.0  ;;  %v55_v21 = vld [vmem:[#allocation2 + $0x90] sm:$0xf]  ;;  %v90_v23 = vsel %vm88_vm6, %v86_v11, 0.0 }
  0x13   :  { %v110_v24 = vld [vmem:[#allocation2 + $0x48] sm:$0xff]  ;;  %v63_v25 = vld [vmem:[#allocation2 + $0x98] sm:$0xf]  ;;  %vm104_vm8 = vcmp.gt.f32.partialorder %v102_v17, 0.0  ;;  %vm41_vm9 = vcmp.gt.f32.partialorder %v39_v18, 0.0  ;;  %vm49_vm10 = vcmp.gt.f32.partialorder %v47_v19, 0.0 }
  0x14   :  { %v68_v16 = vadd.f32 %v66_v12, %v60_v13  ;;  %vm57_vm11 = vcmp.gt.f32.partialorder %v55_v21, 0.0  ;;  %v71_v26 = vld [vmem:[#allocation2 + $0xa0] sm:$0xf]  ;;  %v43_v28 = vsel %vm41_vm9, %v39_v18, 0.0  ;;  %v51_v29 = vsel %vm49_vm10, %v47_v19, 0.0  ;;  %v118_v33 = vld [vmem:[#allocation2 + $0x50] sm:$0xff] }
  0x15   :  { %v59_v30 = vsel %vm57_vm11, %v55_v21, 0.0  ;;  %v79_v31 = vld [vmem:[#allocation2 + $0xa8] sm:$0xf]  ;;  %v98_v32 = vsel %vm96_vm7, %v94_v15, 0.0  ;;  %v53_v34 = vadd.f32 %v51_v29, %v43_v28  ;;  %vm65_vm12 = vcmp.gt.f32.partialorder %v63_v25, 0.0  ;;  %v126_v39 = vld [vmem:[#allocation2 + $0x58] sm:$0xff] }
  0x16   :  { %v76_v22 = vadd.f32 %v74_v14, %v68_v16  ;;  %vm73_vm13 = vcmp.gt.f32.partialorder %v71_v26, 0.0  ;;  %vm112_vm14 = vcmp.gt.f32.partialorder %v110_v24, 0.0  ;;  %v67_v36 = vsel %vm65_vm12, %v63_v25, 0.0  ;;  %v87_v37 = vld [vmem:[#allocation2 + $0xb0] sm:$0xf]  ;;  %v134_v45 = vld [vmem:[#allocation2 + $0x60] sm:$0xff] }
  0x17   :  { %v106_v38 = vsel %vm104_vm8, %v102_v17, 0.0  ;;  %v61_v40 = vadd.f32 %v59_v30, %v53_v34  ;;  %vm81_vm15 = vcmp.gt.f32.partialorder %v79_v31, 0.0  ;;  %vm120_vm0 = vcmp.gt.f32.partialorder %v118_v33, 0.0  ;;  %v95_v43 = vld [vmem:[#allocation2 + $0xb8] sm:$0xf]  ;;  %v142_v51 = vld [vmem:[#allocation2 + $0x68] sm:$0xff] }
  0x18   :  { %v84_v27 = vadd.f32 %v82_v20, %v76_v22  ;;  %v75_v42 = vsel %vm73_vm13, %v71_v26, 0.0  ;;  %v114_v44 = vsel %vm112_vm14, %v110_v24, 0.0  ;;  %vm89_vm1 = vcmp.gt.f32.partialorder %v87_v37, 0.0  ;;  %v103_v49 = vld [vmem:[#allocation2 + $0xc0] sm:$0xf]  ;;  %v150_v57 = vld [vmem:[#allocation2 + $0x70] sm:$0xff] }
  0x19   :  { %v69_v46 = vadd.f32 %v67_v36, %v61_v40  ;;  %vm128_vm2 = vcmp.gt.f32.partialorder %v126_v39, 0.0  ;;  %v83_v48 = vsel %vm81_vm15, %v79_v31, 0.0  ;;  %v122_v50 = vsel %vm120_vm0, %v118_v33, 0.0  ;;  %v111_v55 = vld [vmem:[#allocation2 + $0xc8] sm:$0xf]  ;;  %v158_v63 = vld [vmem:[#allocation2 + $0x78] sm:$0xff] }
  0x1a   :  { %v92_v35 = vadd.f32 %v90_v23, %v84_v27  ;;  %vm97_vm3 = vcmp.gt.f32.partialorder %v95_v43, 0.0  ;;  %vm136_vm4 = vcmp.gt.f32.partialorder %v134_v45, 0.0  ;;  %v91_v54 = vsel %vm89_vm1, %v87_v37, 0.0  ;;  %v119_v61 = vld [vmem:[#allocation2 + $0xd0] sm:$0xf] }
  0x1b   :  { %v77_v52 = vadd.f32 %v75_v42, %v69_v46  ;;  %v130_v56 = vsel %vm128_vm2, %v126_v39, 0.0  ;;  %vm105_vm5 = vcmp.gt.f32.partialorder %v103_v49, 0.0  ;;  %vm144_vm6 = vcmp.gt.f32.partialorder %v142_v51, 0.0  ;;  %v127_v3 = vld [vmem:[#allocation2 + $0xd8] sm:$0xf] }
  0x1c   :  { %v100_v41 = vadd.f32 %v98_v32, %v92_v35  ;;  %v99_v60 = vsel %vm97_vm3, %v95_v43, 0.0  ;;  %v138_v62 = vsel %vm136_vm4, %v134_v45, 0.0  ;;  %vm113_vm7 = vcmp.gt.f32.partialorder %v111_v55, 0.0  ;;  %v135_v8 = vld [vmem:[#allocation2 + $0xe0] sm:$0xf] }
  0x1d   :  { %v85_v58 = vadd.f32 %v83_v48, %v77_v52  ;;  %vm152_vm8 = vcmp.gt.f32.partialorder %v150_v57, 0.0  ;;  %v107_v2 = vsel %vm105_vm5, %v103_v49, 0.0  ;;  %v146_v4 = vsel %vm144_vm6, %v142_v51, 0.0  ;;  %v143_v13 = vld [vmem:[#allocation2 + $0xe8] sm:$0xf] }
  0x1e   :  { %v108_v47 = vadd.f32 %v106_v38, %v100_v41  ;;  %vm121_vm9 = vcmp.gt.f32.partialorder %v119_v61, 0.0  ;;  %vm160_vm10 = vcmp.gt.f32.partialorder %v158_v63, 0.0  ;;  %v115_v7 = vsel %vm113_vm7, %v111_v55, 0.0  ;;  %v151_v18 = vld [vmem:[#allocation2 + $0xf0] sm:$0xf] }
  0x1f   :  { %v93_v0 = vadd.f32 %v91_v54, %v85_v58  ;;  %v154_v9 = vsel %vm152_vm8, %v150_v57, 0.0  ;;  %vm129_vm11 = vcmp.gt.f32.partialorder %v127_v3, 0.0  ;;  %v123_v12 = vsel %vm121_vm9, %v119_v61, 0.0  ;;  %v159_v22 = vld [vmem:[#allocation2 + $0xf8] sm:$0xf] }
  0x20   :  { %v116_v53 = vadd.f32 %v114_v44, %v108_v47  ;;  %v162_v14 = vsel %vm160_vm10, %v158_v63, 0.0  ;;  %vm137_vm12 = vcmp.gt.f32.partialorder %v135_v8, 0.0  ;;  %v131_v17 = vsel %vm129_vm11, %v127_v3, 0.0  ;;  %v167_v30 = vld [vmem:[%s236_s1 + $0x8] sm:$0xf] }
  0x21   :  { %v101_v5 = vadd.f32 %v99_v60, %v93_v0  ;;  %vm145_vm13 = vcmp.gt.f32.partialorder %v143_v13, 0.0  ;;  %v139_v21 = vsel %vm137_vm12, %v135_v8, 0.0  ;;  %vm153_vm14 = vcmp.gt.f32.partialorder %v151_v18, 0.0 }
  0x22   :  { %v124_v59 = vadd.f32 %v122_v50, %v116_v53  ;;  %v147_v24 = vsel %vm145_vm13, %v143_v13, 0.0  ;;  %vm161_vm15 = vcmp.gt.f32.partialorder %v159_v22, 0.0  ;;  %v155_v26 = vsel %vm153_vm14, %v151_v18, 0.0 }
  0x23   :  { %v109_v10 = vadd.f32 %v107_v2, %v101_v5  ;;  %v163_v28 = vsel %vm161_vm15, %v159_v22, 0.0 }
  0x24   :  { %v132_v1 = vadd.f32 %v130_v56, %v124_v59 }
  0x25   :  { %v117_v15 = vadd.f32 %v115_v7, %v109_v10 }
  0x26   :  { %v140_v6 = vadd.f32 %v138_v62, %v132_v1 }
  0x27   :  { %v125_v19 = vadd.f32 %v123_v12, %v117_v15 }
  0x28   :  { %v148_v11 = vadd.f32 %v146_v4, %v140_v6 }
  0x29   :  { %v133_v23 = vadd.f32 %v131_v17, %v125_v19 }
  0x2a   :  { %v156_v16 = vadd.f32 %v154_v9, %v148_v11 }
  0x2b   :  { %v141_v25 = vadd.f32 %v139_v21, %v133_v23 }
  0x2c   :  { %v164_v20 = vadd.f32 %v162_v14, %v156_v16 }
  0x2d   :  { %v149_v27 = vadd.f32 %v147_v24, %v141_v25 }
  0x2e   :  { %170 = vst [vmem:[%s236_s1] sm:$0xff] %v164_v20 }
  0x2f   :  { %v157_v29 = vadd.f32 %v155_v26, %v149_v27 }
  0x31   :  { %v165_v31 = vadd.f32 %v163_v28, %v157_v29 }
  0x33   :  { %v169_v32 = vadd.f32 %v167_v30, %v165_v31 }
  0x35   :  { %171 = vst [vmem:[%s236_s1 + $0x8] sm:$0xf] %v169_v32 }
  0x36   :  { %176 = vsyncpa [#allocation3], 1 }

</bundles_post_ra>
